<compile_context>
chip_gen: v7x
topology: tpu7x:2x2x1
jax: 0.10.0
libtpu: 0.0.40
codegen_flags: <defaults>
</compile_context>

<pallas_src>
import functools

import jax
import jax.numpy as jnp
from jax.experimental import pallas as pl
from jax.experimental.pallas import tpu as pltpu


def _bottleneck_kernel(x_ref, h_ref, w_ref, b_ref, o_ref, *, K, pad, t_tile):
    # x_ref: (1, C_in, Tt)         input tile (T on the lane axis)
    # h_ref: (1, 1, C_in, 2*pad)   halo: [left pad cols | right pad cols]
    # w_ref: (C_out, K*C_in)       conv weight, taps folded into contraction axis
    # b_ref: (C_out, 1)            bias (f32)
    # o_ref: (1, C_out, Tt)        output tile
    xt = x_ref[0]                                      # (C_in, Tt)
    halo = h_ref[0, 0]                                 # (C_in, 2*pad)
    window = jnp.concatenate(
        [halo[:, :pad], xt, halo[:, pad:]], axis=1)    # (C_in, Tt + 2*pad)
    # Stack the K shifted views along the contraction (sublane) axis -> one matmul.
    xs = jnp.concatenate(
        [window[:, k:k + t_tile] for k in range(K)], axis=0)        # (K*C_in, Tt)
    acc = jnp.dot(w_ref[...], xs, preferred_element_type=jnp.float32)  # (C_out, Tt)
    acc = acc + b_ref[...].astype(jnp.float32)
    o_ref[0] = jnp.maximum(acc, 0.0).astype(o_ref.dtype)            # ReLU


def bottleneck_layer(x_nct, weight_oik, bias_o, *, kernel_size=3, t_tile=None):
    """x_nct: [B, C_in, T] (PyTorch conv layout). Returns [B, C_out, T]."""
    B, C_in, T = x_nct.shape
    C_out = weight_oik.shape[0]
    K = kernel_size
    # TODO(synk): kernel_size == 1 (pad == 0) degenerates to a pointwise matmul; not wired up.
    assert K % 2 == 1 and K >= 3, "only odd kernel_size >= 3 (module default is 3)"
    pad = (K - 1) // 2          # matches PyTorch padding=1 for K=3

    # Lane-dense T tile (multiple of 128) when possible, else a single full-T block.
    if t_tile is None:
        t_tile = T
        for cand in (1024, 512, 256, 128):
            if T % cand == 0:
                t_tile = cand
                break
    # TODO(synk): T not divisible by the tile falls back to one full-T block (no masked tail).
    assert T % t_tile == 0
    assert pad <= t_tile
    n_t = T // t_tile

    dtype = x_nct.dtype
    # Fold taps into the contraction axis: w2[o, k*C_in + i] = W[o, i, k]  (tiny tensor).
    w2 = jnp.transpose(weight_oik, (0, 2, 1)).reshape(C_out, K * C_in).astype(dtype)
    b2 = bias_o.reshape(C_out, 1).astype(jnp.float32)

    # Per-tile halo columns: last `pad` cols of the previous tile and first `pad`
    # cols of the next tile (zeros at the sequence edges). Keeps every x tile a
    # plain non-overlapping blocked BlockSpec with no HBM-materialized pad of x.
    xr = x_nct.reshape(B, C_in, n_t, t_tile)
    zpad = jnp.zeros((B, C_in, 1, pad), dtype)
    left = jnp.concatenate([zpad, xr[:, :, : n_t - 1, t_tile - pad:]], axis=2)
    right = jnp.concatenate([xr[:, :, 1:, :pad], zpad], axis=2)
    halo = jnp.transpose(jnp.concatenate([left, right], axis=3), (0, 2, 1, 3))
    # halo: (B, n_t, C_in, 2*pad)

    itemsize = jnp.dtype(dtype).itemsize
    cost = pl.CostEstimate(
        flops=int(2 * B * T * K * C_in * C_out),
        transcendentals=0,
        bytes_accessed=int(
            (x_nct.size + halo.size + w2.size + B * C_out * T) * itemsize
            + b2.size * 4),
    )
    # Double-buffered x / halo / out tiles + grid-invariant weights & bias, with headroom.
    vmem_need = (2 * C_in * t_tile + 2 * C_in * 2 * pad + 2 * C_out * t_tile
                 + K * C_in * C_out) * itemsize + C_out * 4
    vmem_limit = int(min(max(4 * vmem_need, 32 * 1024 * 1024), 48 * 1024 * 1024))

    kernel = functools.partial(_bottleneck_kernel, K=K, pad=pad, t_tile=t_tile)
    return pl.pallas_call(
        kernel,
        out_shape=jax.ShapeDtypeStruct((B, C_out, T), dtype),
        grid_spec=pltpu.PrefetchScalarGridSpec(
            num_scalar_prefetch=0,
            grid=(B, n_t),
            in_specs=[
                pl.BlockSpec((1, C_in, t_tile), lambda b, j: (b, 0, j)),
                pl.BlockSpec((1, 1, C_in, 2 * pad), lambda b, j: (b, j, 0, 0)),
                pl.BlockSpec((C_out, K * C_in), lambda b, j: (0, 0)),   # grid-invariant
                pl.BlockSpec((C_out, 1), lambda b, j: (0, 0)),          # grid-invariant
            ],
            out_specs=pl.BlockSpec((1, C_out, t_tile), lambda b, j: (b, 0, j)),
        ),
        compiler_params=pltpu.CompilerParams(
            dimension_semantics=("parallel", "parallel"),
            vmem_limit_bytes=vmem_limit,
        ),
        cost_estimate=cost,
    )(x_nct, halo, w2, b2)


def make_params(key, in_dim, reduced_dim, kernel_size=3):
    """Deterministic weight-norm Conv1d parameters (v, g, bias) -> effective W."""
    kv, kg, kb = jax.random.split(key, 3)
    v = jax.random.normal(kv, (reduced_dim, in_dim, kernel_size), jnp.float32) * 0.1
    g = 1.0 + 0.05 * jax.random.normal(kg, (reduced_dim,), jnp.float32)
    bias = 0.01 * jax.random.normal(kb, (reduced_dim,), jnp.float32)
    # weight_norm (dim=0): W[o] = g[o] * v[o] / ||v[o]||
    norms = jnp.sqrt(jnp.sum(v * v, axis=(1, 2), keepdims=True)) + 1e-12
    W = g[:, None, None] * v / norms
    return W, bias


def _reference(x, W, bias, pad):
    ref = jax.lax.conv_general_dilated(
        x, W, window_strides=(1,), padding=((pad, pad),),
        dimension_numbers=("NCH", "OIH", "NCH"))
    return jnp.maximum(ref + bias[None, :, None], 0.0)


if __name__ == "__main__":
    key = jax.random.PRNGKey(0)
    k_x, k_p, k_x2 = jax.random.split(key, 3)

    B, in_dim = 2, 32
    reduction_factor = 4
    reduced_dim = in_dim // reduction_factor
    kernel_size = 3
    pad = (kernel_size - 1) // 2

    W, bias = make_params(k_p, in_dim, reduced_dim, kernel_size)

    # Small shape consistent with the module (single full-T block).
    T = 16
    x = jax.random.normal(k_x, (B, in_dim, T), jnp.float32)   # PyTorch NCT layout
    y = jax.block_until_ready(bottleneck_layer(x, W, bias, kernel_size=kernel_size))
    ref = _reference(x, W, bias, pad)
    assert y.shape == (B, reduced_dim, T)
    assert jnp.allclose(y, ref, atol=1e-5, rtol=1e-4)

    # Also exercise the lane-dense tiled path (T split into 128-wide lane tiles + halo).
    T2 = 256
    x2 = jax.random.normal(k_x2, (B, in_dim, T2), jnp.float32)
    y2 = jax.block_until_ready(
        bottleneck_layer(x2, W, bias, kernel_size=kernel_size, t_tile=128))
    ref2 = _reference(x2, W, bias, pad)
    assert y2.shape == (B, reduced_dim, T2)
    assert jnp.allclose(y2, ref2, atol=1e-5, rtol=1e-4)

    print("KERNEL_OK")
</pallas_src>

<mosaic_0001>
module attributes {stable_mosaic.version = 11 : i64} {
  func.func @_bottleneck_kernel(%arg0: i32, %arg1: i32, %arg2: memref<1x32x16xf32, #tpu.memory_space<vmem>>, %arg3: memref<1x1x32x2xf32, #tpu.memory_space<vmem>>, %arg4: memref<8x96xf32, #tpu.memory_space<vmem>>, %arg5: memref<8x1xf32, #tpu.memory_space<vmem>>, %arg6: memref<1x8x16xf32, #tpu.memory_space<vmem>>) attributes {dimension_semantics = [#tpu.dimension_semantics<parallel>, #tpu.dimension_semantics<parallel>], iteration_bounds = array<i64: 2, 1>, scalar_prefetch = 0 : i64, scratch_operands = 0 : i64, tpu.core_type = #tpu.core_type<tc>, window_params = [{transform_indices = @transform_0, window_bounds = array<i64: 1, 32, 16>}, {transform_indices = @transform_1, window_bounds = array<i64: 1, 1, 32, 2>}, {pipeline_mode = #tpu.pipeline_mode<synchronous>, transform_indices = @transform_2, window_bounds = array<i64: 8, 96>}, {pipeline_mode = #tpu.pipeline_mode<synchronous>, transform_indices = @transform_3, window_bounds = array<i64: 8, 1>}, {transform_indices = @transform_4, window_bounds = array<i64: 1, 8, 16>}]} {
    %c0 = arith.constant 0 : index
    %c0_0 = arith.constant 0 : index
    %c0_1 = arith.constant 0 : index
    %0 = vector.load %arg2[%c0, %c0_0, %c0_1] : memref<1x32x16xf32, #tpu.memory_space<vmem>>, vector<1x32x16xf32>
    %1 = vector.shape_cast %0 : vector<1x32x16xf32> to vector<32x16xf32>
    %c0_2 = arith.constant 0 : index
    %c0_3 = arith.constant 0 : index
    %c0_4 = arith.constant 0 : index
    %c0_5 = arith.constant 0 : index
    %2 = vector.load %arg3[%c0_2, %c0_3, %c0_4, %c0_5] : memref<1x1x32x2xf32, #tpu.memory_space<vmem>>, vector<1x1x32x2xf32>
    %3 = vector.shape_cast %2 : vector<1x1x32x2xf32> to vector<32x2xf32>
    %4 = vector.extract_strided_slice %3 {offsets = [0, 0], sizes = [32, 1], strides = [1, 1]} : vector<32x2xf32> to vector<32x1xf32>
    %5 = vector.extract_strided_slice %3 {offsets = [0, 1], sizes = [32, 1], strides = [1, 1]} : vector<32x2xf32> to vector<32x1xf32>
    %6 = tpu.concatenate %4, %1, %5 in 1 : vector<32x1xf32>, vector<32x16xf32>, vector<32x1xf32> -> vector<32x18xf32>
    %7 = vector.extract_strided_slice %6 {offsets = [0, 0], sizes = [32, 16], strides = [1, 1]} : vector<32x18xf32> to vector<32x16xf32>
    %8 = vector.extract_strided_slice %6 {offsets = [0, 1], sizes = [32, 16], strides = [1, 1]} : vector<32x18xf32> to vector<32x16xf32>
    %9 = vector.extract_strided_slice %6 {offsets = [0, 2], sizes = [32, 16], strides = [1, 1]} : vector<32x18xf32> to vector<32x16xf32>
    %10 = tpu.concatenate %7, %8, %9 in 0 : vector<32x16xf32>, vector<32x16xf32>, vector<32x16xf32> -> vector<96x16xf32>
    %c0_6 = arith.constant 0 : index
    %c0_7 = arith.constant 0 : index
    %11 = vector.load %arg4[%c0_6, %c0_7] : memref<8x96xf32, #tpu.memory_space<vmem>>, vector<8x96xf32>
    %cst = arith.constant dense<0.000000e+00> : vector<8x16xf32>
    %12 = tpu.matmul %11, %10, %cst {dimension_numbers = #tpu.dot_dimension_numbers<[1], [0], [0], [1], [0, 0, 1, 1], [], []>} : vector<8x96xf32>, vector<96x16xf32>, vector<8x16xf32> -> vector<8x16xf32>
    %c0_8 = arith.constant 0 : index
    %c0_9 = arith.constant 0 : index
    %13 = vector.load %arg5[%c0_8, %c0_9] : memref<8x1xf32, #tpu.memory_space<vmem>>, vector<8x1xf32>
    %14 = vector.broadcast %13 : vector<8x1xf32> to vector<8x16xf32>
    %15 = arith.addf %12, %14 : vector<8x16xf32>
    %cst_10 = arith.constant 0.000000e+00 : f32
    %16 = vector.broadcast %cst_10 : f32 to vector<8x16xf32>
    %17 = arith.maximumf %15, %16 : vector<8x16xf32>
    %c0_11 = arith.constant 0 : index
    %c0_12 = arith.constant 0 : index
    %c0_13 = arith.constant 0 : index
    %18 = vector.load %arg6[%c0_11, %c0_12, %c0_13] : memref<1x8x16xf32, #tpu.memory_space<vmem>>, vector<1x8x16xf32>
    %19 = vector.shape_cast %18 : vector<1x8x16xf32> to vector<8x16xf32>
    %20 = vector.shape_cast %17 : vector<8x16xf32> to vector<1x8x16xf32>
    tpu.vector_store %arg6[%c0_11, %c0_12, %c0_13], %20 {strides = array<i32>} : memref<1x8x16xf32, #tpu.memory_space<vmem>>, vector<1x8x16xf32>,
    return
  }
  func.func @transform_0(%arg0: i32, %arg1: i32) -> (i32, i32, i32) {
    %c0_i32 = arith.constant 0 : i32
    %c0_i32_0 = arith.constant 0 : i32
    return %arg0, %c0_i32, %arg1 : i32, i32, i32
  }
  func.func @transform_1(%arg0: i32, %arg1: i32) -> (i32, i32, i32, i32) {
    %c0_i32 = arith.constant 0 : i32
    %c0_i32_0 = arith.constant 0 : i32
    %c0_i32_1 = arith.constant 0 : i32
    return %arg0, %arg1, %c0_i32, %c0_i32_0 : i32, i32, i32, i32
  }
  func.func @transform_2(%arg0: i32, %arg1: i32) -> (i32, i32) {
    %c0_i32 = arith.constant 0 : i32
    %c0_i32_0 = arith.constant 0 : i32
    %c0_i32_1 = arith.constant 0 : i32
    return %c0_i32, %c0_i32_0 : i32, i32
  }
  func.func @transform_3(%arg0: i32, %arg1: i32) -> (i32, i32) {
    %c0_i32 = arith.constant 0 : i32
    %c0_i32_0 = arith.constant 0 : i32
    %c0_i32_1 = arith.constant 0 : i32
    return %c0_i32, %c0_i32_0 : i32, i32
  }
  func.func @transform_4(%arg0: i32, %arg1: i32) -> (i32, i32, i32) {
    %c0_i32 = arith.constant 0 : i32
    %c0_i32_0 = arith.constant 0 : i32
    return %arg0, %c0_i32, %arg1 : i32, i32, i32
  }
}

</mosaic_0001>

<bundles_post_ra>
// kernel: tpu_custom_call.1
= control target key start
LH: loop header
LB: loop body
LE: loop exit
PB: predicated region body
PF: predicated region fallthrough
CT: control target
= control target key end

     0   :  { %9 = vsyncpa [#allocation3], 0  ;;  %s947_s0 = inlined_call_operand.vmem [shape: f32[2,32,16], index: 0, kind: input, shape index: {}]   ;;  %s948_s1 = inlined_call_operand.vmem [shape: f32[2,1,32,2], index: 1, kind: input, shape index: {}]   ;;  %s949_s2 = inlined_call_operand.vmem [shape: f32[8,96], index: 2, kind: input, shape index: {}]   ;;  %s950_s3 = inlined_call_operand.vmem [shape: f32[8,1], index: 3, kind: input, shape index: {}]   ;;  %s951_s4 = inlined_call_operand.hbm [shape: f32[2,8,16], index: 4, kind: output, shape index: {}]  }
   0x1   :  { %11 = vsyncpa [#allocation3 + $0x1], 0  ;;  %s820_s15 = smov 0   ;;  %s822_s16 = smov 0  }
   0x2   :  { %s824_s17 = smov 0   ;;  %s826_s18 = smov 0  }
   0x3   :  { %s828_s19 = smov 0   ;;  %s830_s20 = smov 0  }
   0x4 LB: > { %s527_s21 = sadd.s32 4294967295, %s784_s20   ;;  %s528_s22 = sadd.s32 4294967294, %s784_s20   ;;  %s784_s20 = sphi %s830_s20, %s17_s20   ;;  %s780_s19 = sphi %s828_s19, %s958_s19   ;;  %s776_s18 = sphi %s826_s18, %s957_s18   ;;  %s772_s17 = sphi %s824_s17, %s956_s17   ;;  %s768_s16 = sphi %s822_s16, %s955_s16   ;;  %s764_s15 = sphi %s820_s15, %s954_s15  }
   0x5   : > { %s29_s23 = sadd.s32 1, %s780_s19  ;;  %s136_s24 = sadd.s32 1, %s772_s17 }
   0x6   : > { %p31_p0 = scmp.ge.s32.totalorder %s29_s23, 2  ;;  %p146_p1 = scmp.ne.s32.totalorder %s772_s17, %s768_s16 }
   0x7   : > { %p147_p2 = scmp.eq.s32.totalorder %s527_s21, 1  ;;  %p152_p3 = scmp.ne.s32.totalorder %s768_s16, %s764_s15 }
   0x8   : > { %s960_s23 = smov (%p31_p0, %s29_s23), 0  ;;  %p153_p5 = scmp.eq.s32.totalorder %s528_s22, 1 }
   0x9   : > { %p860_p4 = por %p147_p2, %p146_p1  ;;  %s131_s26 = ssub.s32 %s780_s19, %s960_s23 }
   0xa   : > { %p531_p6 = scmp.ge.s32.totalorder %s784_s20, 1  ;;  %p134_p7 = scmp.eq.s32.totalorder %s131_s26, 0 }
   0xb   : > { %p867_p8 = por %p153_p5, %p152_p3  ;;  %p200_p9 = scmp.lt.s32.totalorder %s784_s20, 3 }
   0xc   : > { %s873_s28 = scalar_select %p134_p7, %s772_s17, %s136_s24  }
   0xd   : > { %p201_p10 = pnand %p531_p6, %p200_p9 }
   0xe   : > { %p238_p11 = scmp.lt.s32.totalorder (!%p201_p10), %s776_s18, 1  ;;  %v786_v0 = vmov (!%p201_p10), 0.0|0.0   ;;  %s787_s11 = smov (!%p201_p10), 1   ;;  %vm295_vm0 = vcmask (!%p201_p10), 7168   ;;  %vm300_vm1 = vcmask (!%p201_p10), 138240   ;;  %vm791_vm2 = vmmov (!%p201_p10), 0  }
   0xf   : > { %204 = sbr.rel (%p201_p10) target bundleno = 518 (0x206), region = 36  ;;  %584 = vmatprep.subr.bf16.mxu0 (!%p201_p10), %v786_v0  ;;  %s788_s12 = smov (!%p201_p10), 16   ;;  %v792_v37 = vmov (!%p201_p10), 0.0   ;;  %v334_v38 = vld [vmem:[%s950_s3] sm:$0xff] (!%p201_p10)  ;;  %v793_v39 = vmov (!%p201_p10), 0   ;;  %vm340_vm3 = vcmask (!%p201_p10), 785408  }
  0x10   : > { %s789_s13 = smov (!%p201_p10), 127   ;;  %s790_s14 = smov (!%p201_p10), 126   ;;  %581 = vmatprep.mubr.msk.f32.mxu0 (!%p201_p10), %vm791_vm2, %v792_v37  ;;  %705 = vset.pattern.permute.xlu0 (!%p201_p10), %v793_v39  ;;  %v333_v56 = vld [vmem:[%s949_s2] sm:$0xff] (!%p201_p10)  ;;  %vm415_vm4 = vcmask (!%p201_p10), 130048  }
  0x11   : > { %s539_s5 = sshll.u32 (!%p201_p10), %s776_s18, 7 }
  0x16   : > { %s239_s29 = scalar_select %p238_p11, %s776_s18, 1 }
  0x17   : > { %s794_s18 = smov [#allocation2]  }
  0x18   : > { %s542_s30 = sshll.u32 %s239_s29, 5  ;;  %s235_s29 = sand.u32 1, %s768_s16  }
  0x19   : > { %s245_s7 = scalar_lea.vmem %s947_s0, %s542_s30  ;;  %s254_s10 = scalar_lea.vmem %s948_s1, %s542_s30 }
  0x1a   : > { %v257_v1 = vld [vmem:[%s245_s7 + $0x10] sm:$0xff]  ;;  %v258_v2 = vld [vmem:[%s245_s7 + $0x18] sm:$0xff]  ;;  %v255_v3 = vld [vmem:[%s245_s7] sm:$0xff]  ;;  %s532_s30 = sshll.u32 %s235_s29, 3 }
  0x1b   : > { %v675_v4 = vpack.i.bf16 %v258_v2, %v257_v1  ;;  %v256_v5 = vld [vmem:[%s245_s7 + $0x8] sm:$0xff]  ;;  %v261_v6 = vld [vmem:[%s254_s10 + $0x10] sm:$0xff]  ;;  %v262_v7 = vld [vmem:[%s254_s10 + $0x18] sm:$0xff]  ;;  %s237_s6 = scalar_lea.vmem [#allocation2], %s532_s30 }
  0x1c   : > { %v665_v8 = vpack.i.bf16 %v256_v5, %v255_v3  ;;  %v259_v9 = vld [vmem:[%s254_s10] sm:$0xff]  ;;  %v260_v10 = vld [vmem:[%s254_s10 + $0x8] sm:$0xff]  ;;  %v680_v11 = vpack.i.bf16 %v262_v7, %v261_v6  ;;  %s432_s7 = sshll.u32 %s237_s6, 4  ;;  %s900_s10 = scalar_lea.hbm %s951_s4, %s539_s5  ;;  %s902_s7 = int_to_ptr.vmem [resolvable:$true] %s432_s7 }
  0x1d   : > { %676 = vrot.lane.b32.xlu1 %v675_v4, %s787_s11  ;;  %v670_v12 = vpack.i.bf16 %v260_v10, %v259_v9 }
  0x1e   : > { %666 = vrot.lane.b32.xlu0 %v665_v8, %s787_s11  ;;  %s418_s11 = scalar_lea.sflag [#allocation3], %s235_s29 }
  0x21   : > { %681 = vrot.lane.b32.xlu1 %v680_v11, %s788_s12 }
  0x22   : > { %671 = vrot.lane.b32.xlu0 %v670_v12, %s788_s12  ;;  %s706_s12 = scalar_lea.vmem %s902_s7, 128 }
  0x23   : > { %p707_p12 = scmp.ne.s32.totalorder %s902_s7, %s706_s12 }
  0x25   : > { %p708_p13 = pnand %p707_p12, %p860_p4 }
  0x27   : > { %p709_p0 = pneg %p708_p13 }
  0x8f   : > { %v677_v13 = vpop.permute.xlu1 %676 }
  0x90   : > { %v679_v14 = vunpack.i.h.bf16 %v677_v13  ;;  %v678_v15 = vunpack.i.l.bf16 %v677_v13  ;;  %v667_v16 = vpop.permute.xlu0 %666 }
  0x91   : > { %v669_v17 = vunpack.i.h.bf16 %v667_v16  ;;  %v668_v18 = vunpack.i.l.bf16 %v667_v16 }
  0x92   : > { %v299_v19 = vsel %vm295_vm0, %v262_v7, %v679_v14  ;;  %v298_v20 = vsel %vm295_vm0, %v261_v6, %v678_v15 }
  0x93   : > { %v682_v21 = vpop.permute.xlu1 %681  ;;  %v297_v27 = vsel %vm295_vm0, %v260_v10, %v669_v17  ;;  %v296_v28 = vsel %vm295_vm0, %v259_v9, %v668_v18 }
  0x94   : > { %v684_v22 = vunpack.i.h.bf16 %v682_v21  ;;  %v683_v23 = vunpack.i.l.bf16 %v682_v21  ;;  %v672_v24 = vpop.permute.xlu0 %671 }
  0x95   : > { %v674_v25 = vunpack.i.h.bf16 %v672_v24  ;;  %v673_v26 = vunpack.i.l.bf16 %v672_v24 }
  0x96   : > { %v303_v29 = vsel %vm300_vm1, %v298_v20, %v683_v23  ;;  %v304_v30 = vsel %vm300_vm1, %v299_v19, %v684_v22 }
  0x97   : > { %v690_v31 = vpack.i.bf16 %v304_v30, %v303_v29  ;;  %v301_v32 = vsel %vm300_vm1, %v296_v28, %v673_v26  ;;  %v302_v33 = vsel %vm300_vm1, %v297_v27, %v674_v25  ;;  %v588_v36 = vpack.c.bf16 %v304_v30, %v303_v29 }
  0x98   : > { %v685_v34 = vpack.i.bf16 %v302_v33, %v301_v32  ;;  %v585_v35 = vpack.c.bf16 %v302_v33, %v301_v32 }
  0x99   : > { %691 = vrot.lane.b32.xlu1 %v690_v31, %s789_s13 }
  0x9a   : > { %686 = vrot.lane.b32.xlu0 %v685_v34, %s789_s13  ;;  %586 = vmatpush3.bf16.msra.mxu0 %v585_v35  ;;  %s710_s13 = sshll.u32 %s794_s18, 4  ;;  %s711_s13 = int_to_ptr.vmem [resolvable:$false] %s710_s13 }
  0x9b   : > { %587 = vmatprep.subr.bf16.mxu0 %v786_v0  ;;  %p713_p1 = scmp.lt.s32.totalorder %s902_s7, %s711_s13 }
  0x9d   : > { %701 = vrot.lane.b32.xlu1 %v690_v31, %s790_s14 }
  0x9e   : > { %696 = vrot.lane.b32.xlu0 %v685_v34, %s790_s14  ;;  %589 = vmatpush3.bf16.msra.mxu0 %v588_v36  ;;  %s712_s14 = scalar_lea.vmem %s711_s13, 256 }
  0x9f   : > { %590 = vmatprep.subr.bf16.mxu0 %v786_v0  ;;  %p714_p2 = scmp.lt.s32.totalorder %s712_s14, %s706_s12 }
  0xa1   : > { %p715_p3 = por %p714_p2, %p713_p1 }
  0xa2   : > { %337 = vperm.xlu0 %705, %v334_v38  }
  0xa3   : > { %p716_p5 = pnand %p715_p3, %p709_p0 }
 0x10b   : > { %v692_v40 = vpop.permute.xlu1 %691 }
 0x10c   : > { %v687_v41 = vpop.permute.xlu0 %686  ;;  %v694_v44 = vunpack.i.h.bf16 %v692_v40  ;;  %v693_v45 = vunpack.i.l.bf16 %v692_v40 }
 0x10d   : > { %v689_v42 = vunpack.i.h.bf16 %v687_v41  ;;  %v688_v43 = vunpack.i.l.bf16 %v687_v41 }
 0x10e   : > { %v594_v48 = vpack.c.bf16 %v694_v44, %v693_v45 }
 0x10f   : > { %v591_v46 = vpack.c.bf16 %v689_v42, %v688_v43  ;;  %v702_v51 = vpop.permute.xlu1 %701 }
 0x110   : > { %v697_v47 = vpop.permute.xlu0 %696  ;;  %v704_v52 = vunpack.i.h.bf16 %v702_v51  ;;  %v703_v53 = vunpack.i.l.bf16 %v702_v51 }
 0x111   : > { %592 = vmatpush3.bf16.msra.mxu0 %v591_v46  ;;  %v699_v49 = vunpack.i.h.bf16 %v697_v47  ;;  %v698_v50 = vunpack.i.l.bf16 %v697_v47 }
 0x112   : > { %593 = vmatprep.subr.bf16.mxu0 %v786_v0  ;;  %v600_v55 = vpack.c.bf16 %v704_v52, %v703_v53 }
 0x113   : > { %v597_v54 = vpack.c.bf16 %v699_v49, %v698_v50 }
 0x115   : > { %595 = vmatpush3.bf16.msra.mxu0 %v594_v48 }
 0x116   : > { %596 = vmatprep.subr.bf16.mxu0 %v786_v0 }
 0x119   : > { %598 = vmatpush3.bf16.msra.mxu0 %v597_v54 }
 0x11a   : > { %599 = vmatprep.subr.bf16.mxu0 %v786_v0 }
 0x11d   : > { %601 = vmatpush3.bf16.msra.mxu0 %v600_v55 }
 0x120   : > { %582 = vmatmul.mubr.msk.f32.vlgmr.msra.gmra.mrb[0].mxu0 %vm340_vm3, %v333_v56 }
 0x121   : > { %v338_v57 = vpop.permute.xlu0 %337 }
 0x1f3   : > { %v410_v58 = vpop.f32.mrb[0].mxu0 }
 0x1f4   : > { %v411_v59 = vadd.f32 %v410_v58, %v338_v57  ;;  %v583_v60 = vpop.f32.mrb[1].mxu0 }
 0x1f6   : > { %v414_v61 = vmax.f32 %v411_v59, 0.0 }
 0x1f8   : > { %416 = vst.msk [vmem:[%s237_s6] sm:$0xff] %vm415_vm4, %v414_v61 }
 0x1f9   : > { %719 = shalt.err (!%p716_p5)
}
 0x1fa   : > { %s720_s21 = scalar_lea.hbm %s900_s10, 128  ;;  %s724_s26 = scalar_lea.hbm %s951_s4, 256 }
 0x1fb   : > { %p721_p6 = scmp.ne.s32.totalorder %s900_s10, %s720_s21  ;;  %p725_p10 = scmp.lt.u32.totalorder %s900_s10, %s951_s4 }
 0x1fc   : > { %p726_p11 = scmp.lt.u32.totalorder %s724_s26, %s720_s21  ;;  %p728_p13 = scmp.lt.u32.totalorder %s720_s21, %s900_s10 }
 0x1fd   : > { %p722_p7 = pnand %p721_p6, %p860_p4 }
 0x1fe   : > { %p727_p12 = por %p726_p11, %p725_p10 }
 0x1ff   : > { %p723_p9 = pneg %p722_p7 }
 0x200   : > { %p729_p0 = por %p728_p13, %p727_p12 }
 0x202   : > { %p730_p1 = pnand %p729_p0, %p723_p9 }
 0x204   : > { %733 = shalt.err (!%p730_p1)
}
 0x205   : > { %602 = dma.vmem_to_hbm [thread:$0]  (%p860_p4), %s902_s7, 128, %s900_s10, %s418_s11  }
 0x206 PF: > { %p608_p2 = scmp.ge.s32.totalorder %s784_s20, 2  ;;  %s444_s5 = sand.u32 1, %s764_s15  }
 0x207   : > { %s445_s6 = scalar_lea.sflag [#allocation3], %s444_s5 }
 0x208   : > { %p605_p3 = pnand %p608_p2, %p867_p8 }
 0x20a   : > { %759 = dma.done.wait (!%p605_p3), %s445_s6, 128  }
 0x20b   : > { %761 = vsyncadd (!%p605_p3), %s445_s6, 4294967168  ;;  %s17_s20 = sadd.s32 1, %s784_s20   ;;  %s954_s15 = smov %s768_s16 }
 0x20c   : > { %p14_p5 = scmp.ge.s32.totalorder %s17_s20, 4   ;;  %s955_s16 = smov %s772_s17 }
 0x20d   : > { %s956_s17 = smov %s873_s28  ;;  %s957_s18 = smov %s780_s19 }
 0x20e   : > { %s958_s19 = smov %s960_s23  ;;  %16 = sbr.rel (!%p14_p5) target bundleno = 4 (0x4), region = 74 }
 0x215   :  { %450 = vsyncpa [#allocation3], 1 }
 0x216   :  { %452 = vsyncpa [#allocation3 + $0x1], 1 }

</bundles_post_ra>
